<compile_context>
chip_gen: v7x
topology: tpu7x:2x2x1
jax: 0.10.0
libtpu: 0.0.40
codegen_flags: <defaults>
</compile_context>

<pallas_src>
import jax
import jax.numpy as jnp
from jax.experimental import pallas as pl
from jax.experimental.pallas import tpu as pltpu


def shortnet_kernel(xt_ref, w1_ref, b1_ref, ws_ref, bs_ref,
                    w2_ref, b2_ref, w3_ref, b3_ref, out_ref):
    xt = xt_ref[...]                       # (2, T)  transposed input tile
    x0 = xt[0:1, :]                        # (1, T)
    x1 = xt[1:2, :]                        # (1, T)

    w1 = w1_ref[...]                       # (H, 2)  PyTorch (out, in) layout
    ws = ws_ref[...]                       # (H, 2)

    # layer1 and sc1: K=2 contractions -> VPU broadcast FMAs (MXU would waste
    # 2/256 of its contraction dimension and pay MRF drain for no work).
    pre1 = w1[:, 0:1] * x0 + w1[:, 1:2] * x1 + b1_ref[...]        # (H, T)
    sc   = ws[:, 0:1] * x0 + ws[:, 1:2] * x1 + bs_ref[...]        # (H, T)
    hid1 = jnp.tanh(pre1)                                         # (H, T)

    # layer2: (H, H) @ (H, T) on the MXU; batch tile is the lane axis.
    hid2 = jnp.tanh(
        jnp.dot(w2_ref[...], hid1 + sc, preferred_element_type=jnp.float32)
        + b2_ref[...])                                            # (H, T)

    # layer3: (1, H) @ (H, T) -> lane-dense (1, T) logits.
    logits = (jnp.dot(w3_ref[...], sc + hid1 + hid2,
                      preferred_element_type=jnp.float32)
              + b3_ref[...])                                      # (1, T)
    out_ref[...] = jax.nn.sigmoid(logits)


def shortnet_forward(x, params, *, tile_n=1024):
    """x: (N, 2) float32. params: PyTorch-layout (out, in) weights, (out, 1) biases."""
    n = x.shape[0]
    # Lane-dense batch tile: multiple of 128 lanes; large tiles amortize the
    # per-grid-step overhead, small inputs collapse to a single tile.
    if n <= tile_n:
        t = max(128, pl.cdiv(n, 128) * 128)
    else:
        t = tile_n
    n_pad = pl.cdiv(n, t) * t
    xt = jnp.pad(x.astype(jnp.float32).T, ((0, 0), (0, n_pad - n)))   # (2, n_pad)

    w1, b1 = params["w1"], params["b1"]
    ws, bs = params["ws"], params["bs"]
    w2, b2 = params["w2"], params["b2"]
    w3, b3 = params["w3"], params["b3"]

    # Weights/biases: full-array blocks, constant index_map -> resident in VMEM
    # across every grid step (no re-DMA).
    resident = lambda a: pl.BlockSpec(a.shape, lambda i: (0,) * a.ndim,
                                      memory_space=pltpu.VMEM)

    out_t = pl.pallas_call(
        shortnet_kernel,
        out_shape=jax.ShapeDtypeStruct((1, n_pad), jnp.float32),
        grid=(n_pad // t,),
        in_specs=[
            pl.BlockSpec((2, t), lambda i: (0, i), memory_space=pltpu.VMEM),
            resident(w1), resident(b1), resident(ws), resident(bs),
            resident(w2), resident(b2), resident(w3), resident(b3),
        ],
        out_specs=pl.BlockSpec((1, t), lambda i: (0, i),
                               memory_space=pltpu.VMEM),
        compiler_params=pltpu.CompilerParams(
            dimension_semantics=("parallel",)),
    )(xt, w1, b1, ws, bs, w2, b2, w3, b3)

    return out_t[:, :n].T                                          # (N, 1)


def init_shortnet_params(key, num_hid):
    """PyTorch nn.Linear default init: U[-1/sqrt(fan_in), 1/sqrt(fan_in)].
    Weights stored as (out_features, in_features); biases as (out_features, 1)."""
    ks = jax.random.split(key, 8)

    def lin(kw, kb, fan_in, fan_out):
        bound = 1.0 / jnp.sqrt(float(fan_in))
        w = jax.random.uniform(kw, (fan_out, fan_in), jnp.float32,
                               minval=-bound, maxval=bound)
        b = jax.random.uniform(kb, (fan_out, 1), jnp.float32,
                               minval=-bound, maxval=bound)
        return w, b

    w1, b1 = lin(ks[0], ks[1], 2, num_hid)
    w2, b2 = lin(ks[2], ks[3], num_hid, num_hid)
    w3, b3 = lin(ks[4], ks[5], num_hid, 1)
    ws, bs = lin(ks[6], ks[7], 2, num_hid)
    return dict(w1=w1, b1=b1, w2=w2, b2=b2, w3=w3, b3=b3, ws=ws, bs=bs)


def shortnet_reference(x, p):
    """Pure-JAX mirror of ShortNet.forward."""
    hid1 = jnp.tanh(x @ p["w1"].T + p["b1"].T)
    sc = x @ p["ws"].T + p["bs"].T
    hid2 = jnp.tanh((hid1 + sc) @ p["w2"].T + p["b2"].T)
    out = (sc + hid1 + hid2) @ p["w3"].T + p["b3"].T
    return jax.nn.sigmoid(out)


if __name__ == "__main__":
    key = jax.random.PRNGKey(0)
    k_x, k_x2, k_p = jax.random.split(key, 3)

    num_hid = 32
    params = init_shortnet_params(k_p, num_hid)

    # Small case (single padded tile).
    batch = 8
    x = jax.random.normal(k_x, (batch, 2), dtype=jnp.float32)
    out = jax.block_until_ready(shortnet_forward(x, params))
    ref = shortnet_reference(x, params)
    assert out.shape == (batch, 1), out.shape
    assert jnp.allclose(out, ref, atol=1e-5, rtol=1e-5)

    # Larger, non-multiple-of-tile case (exercises the batch grid + padding).
    batch2 = 2500
    x2 = jax.random.normal(k_x2, (batch2, 2), dtype=jnp.float32)
    out2 = jax.block_until_ready(shortnet_forward(x2, params))
    ref2 = shortnet_reference(x2, params)
    assert out2.shape == (batch2, 1), out2.shape
    assert jnp.allclose(out2, ref2, atol=1e-5, rtol=1e-5)

    print("KERNEL_OK")
</pallas_src>

<mosaic_0001>
module attributes {stable_mosaic.version = 11 : i64} {
  func.func @shortnet_kernel(%arg0: i32, %arg1: memref<2x128xf32, #tpu.memory_space<vmem>>, %arg2: memref<32x2xf32, #tpu.memory_space<vmem>>, %arg3: memref<32x1xf32, #tpu.memory_space<vmem>>, %arg4: memref<32x2xf32, #tpu.memory_space<vmem>>, %arg5: memref<32x1xf32, #tpu.memory_space<vmem>>, %arg6: memref<32x32xf32, #tpu.memory_space<vmem>>, %arg7: memref<32x1xf32, #tpu.memory_space<vmem>>, %arg8: memref<1x32xf32, #tpu.memory_space<vmem>>, %arg9: memref<1x1xf32, #tpu.memory_space<vmem>>, %arg10: memref<1x128xf32, #tpu.memory_space<vmem>>) attributes {dimension_semantics = [#tpu.dimension_semantics<parallel>], iteration_bounds = array<i64: 1>, scalar_prefetch = 0 : i64, scratch_operands = 0 : i64, tpu.core_type = #tpu.core_type<tc>, window_params = [{transform_indices = @transform_0, window_bounds = array<i64: 2, 128>}, {pipeline_mode = #tpu.pipeline_mode<synchronous>, transform_indices = @transform_1, window_bounds = array<i64: 32, 2>}, {pipeline_mode = #tpu.pipeline_mode<synchronous>, transform_indices = @transform_2, window_bounds = array<i64: 32, 1>}, {pipeline_mode = #tpu.pipeline_mode<synchronous>, transform_indices = @transform_3, window_bounds = array<i64: 32, 2>}, {pipeline_mode = #tpu.pipeline_mode<synchronous>, transform_indices = @transform_4, window_bounds = array<i64: 32, 1>}, {pipeline_mode = #tpu.pipeline_mode<synchronous>, transform_indices = @transform_5, window_bounds = array<i64: 32, 32>}, {pipeline_mode = #tpu.pipeline_mode<synchronous>, transform_indices = @transform_6, window_bounds = array<i64: 32, 1>}, {pipeline_mode = #tpu.pipeline_mode<synchronous>, transform_indices = @transform_7, window_bounds = array<i64: 1, 32>}, {pipeline_mode = #tpu.pipeline_mode<synchronous>, transform_indices = @transform_8, window_bounds = array<i64: 1, 1>}, {transform_indices = @transform_9, window_bounds = array<i64: 1, 128>}]} {
    %c0 = arith.constant 0 : index
    %c0_0 = arith.constant 0 : index
    %0 = vector.load %arg1[%c0, %c0_0] : memref<2x128xf32, #tpu.memory_space<vmem>>, vector<2x128xf32>
    %1 = vector.extract_strided_slice %0 {offsets = [0, 0], sizes = [1, 128], strides = [1, 1]} : vector<2x128xf32> to vector<1x128xf32>
    %2 = vector.extract_strided_slice %0 {offsets = [1, 0], sizes = [1, 128], strides = [1, 1]} : vector<2x128xf32> to vector<1x128xf32>
    %c0_1 = arith.constant 0 : index
    %c0_2 = arith.constant 0 : index
    %3 = vector.load %arg2[%c0_1, %c0_2] : memref<32x2xf32, #tpu.memory_space<vmem>>, vector<32x2xf32>
    %c0_3 = arith.constant 0 : index
    %c0_4 = arith.constant 0 : index
    %4 = vector.load %arg4[%c0_3, %c0_4] : memref<32x2xf32, #tpu.memory_space<vmem>>, vector<32x2xf32>
    %5 = vector.extract_strided_slice %3 {offsets = [0, 0], sizes = [32, 1], strides = [1, 1]} : vector<32x2xf32> to vector<32x1xf32>
    %6 = vector.broadcast %5 : vector<32x1xf32> to vector<32x128xf32>
    %7 = vector.broadcast %1 : vector<1x128xf32> to vector<32x128xf32>
    %8 = arith.mulf %6, %7 : vector<32x128xf32>
    %9 = vector.extract_strided_slice %3 {offsets = [0, 1], sizes = [32, 1], strides = [1, 1]} : vector<32x2xf32> to vector<32x1xf32>
    %10 = vector.broadcast %9 : vector<32x1xf32> to vector<32x128xf32>
    %11 = vector.broadcast %2 : vector<1x128xf32> to vector<32x128xf32>
    %12 = arith.mulf %10, %11 : vector<32x128xf32>
    %13 = arith.addf %8, %12 : vector<32x128xf32>
    %c0_5 = arith.constant 0 : index
    %c0_6 = arith.constant 0 : index
    %14 = vector.load %arg3[%c0_5, %c0_6] : memref<32x1xf32, #tpu.memory_space<vmem>>, vector<32x1xf32>
    %15 = vector.broadcast %14 : vector<32x1xf32> to vector<32x128xf32>
    %16 = arith.addf %13, %15 : vector<32x128xf32>
    %17 = vector.extract_strided_slice %4 {offsets = [0, 0], sizes = [32, 1], strides = [1, 1]} : vector<32x2xf32> to vector<32x1xf32>
    %18 = vector.broadcast %17 : vector<32x1xf32> to vector<32x128xf32>
    %19 = vector.broadcast %1 : vector<1x128xf32> to vector<32x128xf32>
    %20 = arith.mulf %18, %19 : vector<32x128xf32>
    %21 = vector.extract_strided_slice %4 {offsets = [0, 1], sizes = [32, 1], strides = [1, 1]} : vector<32x2xf32> to vector<32x1xf32>
    %22 = vector.broadcast %21 : vector<32x1xf32> to vector<32x128xf32>
    %23 = vector.broadcast %2 : vector<1x128xf32> to vector<32x128xf32>
    %24 = arith.mulf %22, %23 : vector<32x128xf32>
    %25 = arith.addf %20, %24 : vector<32x128xf32>
    %c0_7 = arith.constant 0 : index
    %c0_8 = arith.constant 0 : index
    %26 = vector.load %arg5[%c0_7, %c0_8] : memref<32x1xf32, #tpu.memory_space<vmem>>, vector<32x1xf32>
    %27 = vector.broadcast %26 : vector<32x1xf32> to vector<32x128xf32>
    %28 = arith.addf %25, %27 : vector<32x128xf32>
    %29 = math.tanh %16 : vector<32x128xf32>
    %c0_9 = arith.constant 0 : index
    %c0_10 = arith.constant 0 : index
    %30 = vector.load %arg6[%c0_9, %c0_10] : memref<32x32xf32, #tpu.memory_space<vmem>>, vector<32x32xf32>
    %31 = arith.addf %29, %28 : vector<32x128xf32>
    %cst = arith.constant dense<0.000000e+00> : vector<32x128xf32>
    %32 = tpu.matmul %30, %31, %cst {dimension_numbers = #tpu.dot_dimension_numbers<[1], [0], [0], [1], [0, 0, 1, 1], [], []>} : vector<32x32xf32>, vector<32x128xf32>, vector<32x128xf32> -> vector<32x128xf32>
    %c0_11 = arith.constant 0 : index
    %c0_12 = arith.constant 0 : index
    %33 = vector.load %arg7[%c0_11, %c0_12] : memref<32x1xf32, #tpu.memory_space<vmem>>, vector<32x1xf32>
    %34 = vector.broadcast %33 : vector<32x1xf32> to vector<32x128xf32>
    %35 = arith.addf %32, %34 : vector<32x128xf32>
    %36 = math.tanh %35 : vector<32x128xf32>
    %c0_13 = arith.constant 0 : index
    %c0_14 = arith.constant 0 : index
    %37 = vector.load %arg8[%c0_13, %c0_14] : memref<1x32xf32, #tpu.memory_space<vmem>>, vector<1x32xf32>
    %38 = arith.addf %28, %29 : vector<32x128xf32>
    %39 = arith.addf %38, %36 : vector<32x128xf32>
    %cst_15 = arith.constant dense<0.000000e+00> : vector<1x128xf32>
    %40 = tpu.matmul %37, %39, %cst_15 {dimension_numbers = #tpu.dot_dimension_numbers<[1], [0], [0], [1], [0, 0, 1, 1], [], []>} : vector<1x32xf32>, vector<32x128xf32>, vector<1x128xf32> -> vector<1x128xf32>
    %c0_16 = arith.constant 0 : index
    %c0_17 = arith.constant 0 : index
    %41 = vector.load %arg9[%c0_16, %c0_17] : memref<1x1xf32, #tpu.memory_space<vmem>>, vector<1x1xf32>
    %42 = vector.broadcast %41 : vector<1x1xf32> to vector<1x128xf32>
    %43 = arith.addf %40, %42 : vector<1x128xf32>
    %44 = arith.negf %43 : vector<1x128xf32>
    %45 = math.exp %44 : vector<1x128xf32>
    %cst_18 = arith.constant 1.000000e+00 : f32
    %46 = vector.broadcast %cst_18 : f32 to vector<1x128xf32>
    %47 = arith.addf %46, %45 : vector<1x128xf32>
    %48 = arith.divf %46, %47 : vector<1x128xf32>
    %c0_19 = arith.constant 0 : index
    %c0_20 = arith.constant 0 : index
    %49 = vector.load %arg10[%c0_19, %c0_20] : memref<1x128xf32, #tpu.memory_space<vmem>>, vector<1x128xf32>
    tpu.vector_store %arg10[%c0_19, %c0_20], %48 {strides = array<i32>} : memref<1x128xf32, #tpu.memory_space<vmem>>, vector<1x128xf32>,
    return
  }
  func.func @transform_0(%arg0: i32) -> (i32, i32) {
    %c0_i32 = arith.constant 0 : i32
    %c0_i32_0 = arith.constant 0 : i32
    return %c0_i32, %arg0 : i32, i32
  }
  func.func @transform_1(%arg0: i32) -> (i32, i32) {
    %c0_i32 = arith.constant 0 : i32
    %c0_i32_0 = arith.constant 0 : i32
    %c0_i32_1 = arith.constant 0 : i32
    return %c0_i32, %c0_i32_0 : i32, i32
  }
  func.func @transform_2(%arg0: i32) -> (i32, i32) {
    %c0_i32 = arith.constant 0 : i32
    %c0_i32_0 = arith.constant 0 : i32
    %c0_i32_1 = arith.constant 0 : i32
    return %c0_i32, %c0_i32_0 : i32, i32
  }
  func.func @transform_3(%arg0: i32) -> (i32, i32) {
    %c0_i32 = arith.constant 0 : i32
    %c0_i32_0 = arith.constant 0 : i32
    %c0_i32_1 = arith.constant 0 : i32
    return %c0_i32, %c0_i32_0 : i32, i32
  }
  func.func @transform_4(%arg0: i32) -> (i32, i32) {
    %c0_i32 = arith.constant 0 : i32
    %c0_i32_0 = arith.constant 0 : i32
    %c0_i32_1 = arith.constant 0 : i32
    return %c0_i32, %c0_i32_0 : i32, i32
  }
  func.func @transform_5(%arg0: i32) -> (i32, i32) {
    %c0_i32 = arith.constant 0 : i32
    %c0_i32_0 = arith.constant 0 : i32
    %c0_i32_1 = arith.constant 0 : i32
    return %c0_i32, %c0_i32_0 : i32, i32
  }
  func.func @transform_6(%arg0: i32) -> (i32, i32) {
    %c0_i32 = arith.constant 0 : i32
    %c0_i32_0 = arith.constant 0 : i32
    %c0_i32_1 = arith.constant 0 : i32
    return %c0_i32, %c0_i32_0 : i32, i32
  }
  func.func @transform_7(%arg0: i32) -> (i32, i32) {
    %c0_i32 = arith.constant 0 : i32
    %c0_i32_0 = arith.constant 0 : i32
    %c0_i32_1 = arith.constant 0 : i32
    return %c0_i32, %c0_i32_0 : i32, i32
  }
  func.func @transform_8(%arg0: i32) -> (i32, i32) {
    %c0_i32 = arith.constant 0 : i32
    %c0_i32_0 = arith.constant 0 : i32
    %c0_i32_1 = arith.constant 0 : i32
    return %c0_i32, %c0_i32_0 : i32, i32
  }
  func.func @transform_9(%arg0: i32) -> (i32, i32) {
    %c0_i32 = arith.constant 0 : i32
    %c0_i32_0 = arith.constant 0 : i32
    return %c0_i32, %arg0 : i32, i32
  }
}

</mosaic_0001>

<bundles_post_ra>
// kernel: tpu_custom_call.1
= control target key start
LH: loop header
LB: loop body
LE: loop exit
PB: predicated region body
PF: predicated region fallthrough
CT: control target
= control target key end

     0   :  { %s731_s0 = inlined_call_operand.vmem [shape: f32[2,128], index: 0, kind: input, shape index: {}]   ;;  %s732_s1 = inlined_call_operand.vmem [shape: f32[32,2], index: 1, kind: input, shape index: {}]   ;;  %s733_s2 = inlined_call_operand.vmem [shape: f32[32,1], index: 2, kind: input, shape index: {}]   ;;  %s734_s3 = inlined_call_operand.vmem [shape: f32[32,2], index: 3, kind: input, shape index: {}]   ;;  %s735_s4 = inlined_call_operand.vmem [shape: f32[32,1], index: 4, kind: input, shape index: {}]   ;;  %s736_s5 = inlined_call_operand.vmem [shape: f32[32,32], index: 5, kind: input, shape index: {}]   ;;  %s737_s6 = inlined_call_operand.vmem [shape: f32[32,1], index: 6, kind: input, shape index: {}]   ;;  %s738_s7 = inlined_call_operand.vmem [shape: f32[1,32], index: 7, kind: input, shape index: {}]   ;;  %s739_s8 = inlined_call_operand.<no memory space> [shape: f32[1,1], index: 8, kind: input, shape index: {}]   ;;  %s740_s9 = inlined_call_operand.hbm [shape: f32[1,128], index: 9, kind: output, shape index: {}]  }
   0x1   :  { %v14_v0 = vstv %s739_s8 }
   0x2   :  { %15 = vst [vmem:[#allocation2] sm:$0x1] %v14_v0 }
   0x3   :  { %v38_v1 = vld [vmem:[%s732_s1 + $0x10] sm:$0xff]  ;;  %v36_v2 = vld [vmem:[%s732_s1] sm:$0xff]  ;;  %v569_v3 = vmov 1   ;;  %v37_v5 = vld [vmem:[%s732_s1 + $0x8] sm:$0xff] }
   0x4   :  { %517 = vset.pattern.permute.xlu0 %v569_v3  ;;  %515 = vset.pattern.permute.xlu1 %v569_v3  ;;  %v40_v4 = vld [vmem:[%s734_s3] sm:$0xff] }
   0x5   :  { %81 = vperm.xlu0 %517, %v38_v1   ;;  %73 = vperm.xlu1 %515, %v36_v2  }
   0x9   :  { %153 = vperm.xlu0 %517, %v40_v4   ;;  %77 = vperm.xlu1 %515, %v37_v5  }
   0xa   :  { %16 = vsyncpa [#allocation4], 0  ;;  %v39_v6 = vld [vmem:[%s732_s1 + $0x18] sm:$0xff]  ;;  %v570_v7 = vmov 0   ;;  %v100_v8 = vld [vmem:[%s733_s2] sm:$0xff]  ;;  %vm240_vm0 = vcmask 261120   ;;  %v64_v34 = vlaneseq }
   0xb   :  { %v101_v9 = vld [vmem:[%s733_s2 + $0x8] sm:$0xff]  ;;  %v102_v10 = vld [vmem:[%s733_s2 + $0x10] sm:$0xff]  ;;  %v103_v11 = vld [vmem:[%s733_s2 + $0x18] sm:$0xff]  ;;  %vm572_vm1 = vmmov 0   ;;  %s574_s11 = smov [#allocation3]  }
   0xc   :  { %v43_v12 = vld [vmem:[%s734_s3 + $0x18] sm:$0xff]  ;;  %v41_v13 = vld [vmem:[%s734_s3 + $0x8] sm:$0xff]  ;;  %v176_v14 = vld [vmem:[%s735_s4] sm:$0xff]  ;;  %v692_v36 = vshrl.u32 %v64_v34, 7  ;;  %s443_s12 = sshll.u32 %s574_s11, 4  ;;  %s444_s12 = int_to_ptr.vmem [resolvable:$true] %s443_s12 }
   0xd   :  { %520 = vset.pattern.permute.xlu0 %v570_v7  ;;  %516 = vset.pattern.permute.xlu1 %v570_v7  ;;  %v178_v15 = vld [vmem:[%s735_s4 + $0x10] sm:$0xff]  ;;  %v216_v16 = vld [vmem:[%s737_s6] sm:$0xff]  ;;  %v177_v20 = vld [vmem:[%s735_s4 + $0x8] sm:$0xff]  ;;  %s549_s13 = scalar_lea.vmem %s444_s12, 32  ;;  %p550_p1 = scmp.lt.s32.totalorder %s444_s12, %s444_s12 }
   0xe   :  { %46 = vperm.xlu0 %520, %v36_v2   ;;  %61 = vperm.xlu1 %516, %v39_v6   ;;  %v42_v17 = vld [vmem:[%s734_s3 + $0x10] sm:$0xff]  ;;  %v347_v19 = vld [vmem:[#allocation2] sm:$0x1]  ;;  %v179_v21 = vld [vmem:[%s735_s4 + $0x18] sm:$0xff]  ;;  %v66_v39 = vsub.s32 0, %v692_v36  ;;  %v90_v40 = vsub.s32 1, %v692_v36 }
   0xf   :  { %v218_v18 = vld [vmem:[%s737_s6 + $0x10] sm:$0xff]  ;;  %v217_v22 = vld [vmem:[%s737_s6 + $0x8] sm:$0xff]  ;;  %v219_v23 = vld [vmem:[%s737_s6 + $0x18] sm:$0xff] }
  0x10   :  { %v208_v24 = vld [vmem:[%s736_s5] sm:$0xff]  ;;  %v209_v34 = vld [vmem:[%s736_s5 + $0x8] sm:$0xff] }
  0x11   :  { %478 = vmatprep.mubr.msk.f32.mxu0 %vm240_vm0, %v208_v24  ;;  %v35_v41 = vld [vmem:[%s731_s0] sm:$0x3] }
  0x12   :  { %51 = vperm.xlu0 %520, %v37_v5   ;;  %518 = vset.pattern.permute.xlu1 %v569_v3  ;;  %v67_v43 = vrot.slane %v35_v41, %v66_v39  ;;  %v91_v45 = vrot.slane %v35_v41, %v90_v40  ;;  %v573_v40 = vmov 0.0  }
  0x13   :  { %85 = vperm.xlu1 %518, %v39_v6   ;;  %492 = vmatprep.mubr.msk.f32.mxu1 %vm572_vm1, %v573_v40 }
  0x16   :  { %56 = vperm.xlu0 %520, %v38_v1  }
  0x17   :  { %519 = vset.pattern.permute.xlu1 %v570_v7 }
  0x18   :  { %106 = vperm.xlu1 %519, %v100_v8  }
  0x1a   :  { %111 = vperm.xlu0 %520, %v101_v9  }
  0x1c   :  { %116 = vperm.xlu1 %519, %v102_v10  }
  0x1e   :  { %130 = vperm.xlu0 %520, %v40_v4  }
  0x20   :  { %121 = vperm.xlu1 %519, %v103_v11  }
  0x22   :  { %145 = vperm.xlu0 %520, %v43_v12  }
  0x24   :  { %135 = vperm.xlu1 %519, %v41_v13  }
  0x26   :  { %182 = vperm.xlu0 %520, %v176_v14  }
  0x28   :  { %521 = vset.pattern.permute.xlu1 %v569_v3 }
  0x29   :  { %157 = vperm.xlu1 %521, %v41_v13  }
  0x2a   :  { %192 = vperm.xlu0 %520, %v178_v15  }
  0x2d   :  { %522 = vset.pattern.permute.xlu1 %v570_v7 }
  0x2e   :  { %222 = vperm.xlu0 %520, %v216_v16   ;;  %140 = vperm.xlu1 %522, %v42_v17  }
  0x32   :  { %232 = vperm.xlu0 %520, %v218_v18   ;;  %523 = vset.pattern.permute.xlu1 %v569_v3 }
  0x33   :  { %161 = vperm.xlu1 %523, %v42_v17  }
  0x36   :  { %350 = vperm.xlu0 %520, %v347_v19  }
  0x37   :  { %165 = vperm.xlu1 %523, %v43_v12  }
  0x3b   :  { %524 = vset.pattern.permute.xlu1 %v570_v7 }
  0x3c   :  { %187 = vperm.xlu1 %524, %v177_v20  }
  0x40   :  { %197 = vperm.xlu1 %524, %v179_v21  }
  0x44   :  { %227 = vperm.xlu1 %524, %v217_v22  }
  0x48   :  { %237 = vperm.xlu1 %524, %v219_v23  }
  0x84   :  { %v74_v25 = vpop.permute.xlu1 %73  ;;  %v82_v26 = vpop.permute.xlu0 %81 }
  0x85   :  { %v92_v49 = vmul.f32 %v91_v45, %v74_v25  ;;  %v94_v50 = vmul.f32 %v91_v45, %v82_v26 }
  0x88   :  { %v78_v27 = vpop.permute.xlu1 %77  ;;  %v154_v28 = vpop.permute.xlu0 %153 }
  0x89   :  { %v93_v52 = vmul.f32 %v91_v45, %v78_v27  ;;  %v168_v4 = vmul.f32 %v154_v28, %v91_v45 }
  0x8d   :  { %v62_v29 = vpop.permute.xlu1 %61  ;;  %v47_v31 = vpop.permute.xlu0 %46 }
  0x8e   :  { %v68_v46 = vmul.f32 %v67_v43, %v47_v31  ;;  %v71_v60 = vmul.f32 %v67_v43, %v62_v29 }
  0x90   :  { %v96_v54 = vadd.f32 %v92_v49, %v68_v46 }
  0x91   :  { %v52_v33 = vpop.permute.xlu0 %51 }
  0x92   :  { %v86_v30 = vpop.permute.xlu1 %85  ;;  %v69_v48 = vmul.f32 %v67_v43, %v52_v33 }
  0x93   :  { %v95_v55 = vmul.f32 %v91_v45, %v86_v30 }
  0x94   :  { %v97_v56 = vadd.f32 %v93_v52, %v69_v48 }
  0x95   :  { %v57_v37 = vpop.permute.xlu0 %56  ;;  %v99_v62 = vadd.f32 %v95_v55, %v71_v60 }
  0x96   :  { %v70_v51 = vmul.f32 %v67_v43, %v57_v37  ;;  %v211_v37 = vld [vmem:[%s736_s5 + $0x18] sm:$0xff] }
  0x97   :  { %v107_v32 = vpop.permute.xlu1 %106 }
  0x98   :  { %v124_v58 = vadd.f32 %v107_v32, %v96_v54  ;;  %v98_v59 = vadd.f32 %v94_v50, %v70_v51 }
  0x99   :  { %v112_v44 = vpop.permute.xlu0 %111 }
  0x9a   :  { %v125_v61 = vadd.f32 %v112_v44, %v97_v56  ;;  %525 = vtanh.f32 %v124_v58 }
  0x9b   :  { %v117_v35 = vpop.permute.xlu1 %116 }
  0x9c   :  { %v126_v0 = vadd.f32 %v117_v35, %v98_v59  ;;  %527 = vtanh.f32 %v125_v61  ;;  %v210_v35 = vld [vmem:[%s736_s5 + $0x10] sm:$0xff] }
  0x9d   :  { %v131_v53 = vpop.permute.xlu0 %130 }
  0x9e   :  { %v148_v3 = vmul.f32 %v131_v53, %v67_v43  ;;  %529 = vtanh.f32 %v126_v0 }
  0x9f   :  { %v122_v38 = vpop.permute.xlu1 %121 }
  0xa0   :  { %v127_v2 = vadd.f32 %v122_v38, %v99_v62  ;;  %v172_v10 = vadd.f32 %v168_v4, %v148_v3  ;;  %v571_v38 = vmov 0.0|0.0  }
  0xa1   :  { %v146_v63 = vpop.permute.xlu0 %145  ;;  %503 = vmatprep.subr.bf16.mxu1 %v571_v38 }
  0xa2   :  { %531 = vtanh.f32 %v127_v2  ;;  %v151_v18 = vmul.f32 %v146_v63, %v67_v43  ;;  %v342_v63 = vld [vmem:[%s738_s7] sm:$0x1]  ;;  %s545_s7 = scalar_lea.vmem %s444_s12, 16 }
  0xa3   :  { %v136_v42 = vpop.permute.xlu1 %135  ;;  %p546_p0 = scmp.ne.s32.totalorder %s444_s12, %s545_s7  ;;  %p551_p2 = scmp.lt.s32.totalorder %s549_s13, %s545_s7 }
  0xa4   :  { %v149_v9 = vmul.f32 %v136_v42, %v67_v43  ;;  %v526_v17 = vpop.eup %525 }
  0xa5   :  { %v183_v8 = vpop.permute.xlu0 %182  ;;  %p552_p3 = por %p551_p2, %p550_p1 }
  0xa6   :  { %v200_v12 = vadd.f32 %v183_v8, %v172_v10  ;;  %v528_v20 = vpop.eup %527 }
  0xa7   :  { %p553_p4 = pnand %p552_p3, %p546_p0 }
  0xa8   :  { %v158_v47 = vpop.permute.xlu1 %157  ;;  %v212_v22 = vadd.f32 %v526_v17, %v200_v12  ;;  %v530_v27 = vpop.eup %529 }
  0xa9   :  { %v169_v5 = vmul.f32 %v158_v47, %v91_v45  ;;  %v193_v21 = vpop.permute.xlu0 %192 }
  0xab   :  { %v173_v15 = vadd.f32 %v169_v5, %v149_v9 }
  0xac   :  { %v532_v30 = vpop.eup %531 }
  0xad   :  { %v141_v57 = vpop.permute.xlu1 %140  ;;  %v223_v42 = vpop.permute.xlu0 %222 }
  0xae   :  { %v150_v11 = vmul.f32 %v141_v57, %v67_v43 }
  0xb1   :  { %v233_v49 = vpop.permute.xlu0 %232 }
  0xb2   :  { %v162_v1 = vpop.permute.xlu1 %161 }
  0xb3   :  { %v170_v6 = vmul.f32 %v162_v1, %v91_v45 }
  0xb5   :  { %v174_v13 = vadd.f32 %v170_v6, %v150_v11  ;;  %v351_v0 = vpop.permute.xlu0 %350 }
  0xb6   :  { %v166_v7 = vpop.permute.xlu1 %165  ;;  %v356_v1 = vrot.slane %v351_v0, %v66_v39 }
  0xb7   :  { %v171_v14 = vmul.f32 %v166_v7, %v91_v45  ;;  %v202_v23 = vadd.f32 %v193_v21, %v174_v13 }
  0xb9   :  { %v175_v25 = vadd.f32 %v171_v14, %v151_v18  ;;  %v214_v32 = vadd.f32 %v530_v27, %v202_v23 }
  0xbb   :  { %v188_v16 = vpop.permute.xlu1 %187 }
  0xbc   :  { %v201_v19 = vadd.f32 %v188_v16, %v173_v15 }
  0xbe   :  { %v213_v24 = vadd.f32 %v528_v20, %v201_v19 }
  0xbf   :  { %v198_v26 = vpop.permute.xlu1 %197 }
  0xc0   :  { %v203_v28 = vadd.f32 %v198_v26, %v175_v25  ;;  %v495_v29 = vpack.c.bf16 %v213_v24, %v212_v22 }
  0xc2   :  { %v215_v31 = vadd.f32 %v532_v30, %v203_v28  ;;  %496 = vmatprep.subr.bf16.mxu0 %v495_v29 }
  0xc3   :  { %498 = vmatpush3.bf16.msra.mxu0 %v495_v29  ;;  %v228_v41 = vpop.permute.xlu1 %227 }
  0xc4   :  { %v499_v33 = vpack.c.bf16 %v215_v31, %v214_v32 }
  0xc6   :  { %500 = vmatprep.subr.bf16.mxu0 %v499_v33 }
  0xc7   :  { %502 = vmatpush3.bf16.msra.mxu0 %v499_v33  ;;  %v238_v47 = vpop.permute.xlu1 %237 }
  0xca   :  { %479 = vmatmul.mubr.msk.f32.vlgmr.msra.gmra.mrb[0].mxu0 %vm240_vm0, %v209_v34 }
  0xcb   :  { %481 = vmatprep.mubr.msk.f32.mxu0 %vm240_vm0, %v210_v35 }
  0xce   :  { %482 = vmatmul.mubr.msk.f32.gmra.mrb[2].mxu0 %vm240_vm0, %v211_v37 }
 0x19d   :  { %v480_v43 = vpop.f32.mrb[0].mxu0 }
 0x19e   :  { %v325_v44 = vadd.f32 %v480_v43, %v228_v41  ;;  %v319_v45 = vpop.f32.mrb[1].mxu0 }
 0x19f   :  { %v320_v46 = vadd.f32 %v319_v45, %v223_v42 }
 0x1a0   :  { %533 = vtanh.f32 %v325_v44 }
 0x1a1   :  { %535 = vtanh.f32 %v320_v46  ;;  %v483_v48 = vpop.f32.mrb[2].mxu0 }
 0x1a2   :  { %v335_v50 = vadd.f32 %v483_v48, %v238_v47  ;;  %v329_v51 = vpop.f32.mrb[3].mxu0 }
 0x1a3   :  { %v330_v52 = vadd.f32 %v329_v51, %v233_v49 }
 0x1a4   :  { %537 = vtanh.f32 %v335_v50 }
 0x1a5   :  { %539 = vtanh.f32 %v330_v52 }
 0x1aa   :  { %v534_v53 = vpop.eup %533 }
 0x1ab   :  { %v536_v54 = vpop.eup %535  ;;  %v344_v55 = vadd.f32 %v534_v53, %v213_v24 }
 0x1ac   :  { %v343_v56 = vadd.f32 %v536_v54, %v212_v22 }
 0x1ae   :  { %v538_v57 = vpop.eup %537  ;;  %v504_v58 = vpack.c.bf16 %v344_v55, %v343_v56 }
 0x1af   :  { %v540_v59 = vpop.eup %539  ;;  %v346_v60 = vadd.f32 %v538_v57, %v215_v31 }
 0x1b0   :  { %505 = vmatpush3.bf16.msra.mxu1 %v504_v58  ;;  %v345_v61 = vadd.f32 %v540_v59, %v214_v32 }
 0x1b1   :  { %506 = vmatprep.subr.bf16.mxu1 %v571_v38 }
 0x1b2   :  { %v507_v62 = vpack.c.bf16 %v346_v60, %v345_v61 }
 0x1b4   :  { %508 = vmatpush3.bf16.msra.mxu1 %v507_v62 }
 0x1b7   :  { %493 = vmatmul.mubr.msk.f32.vlgmr.msra.gmra.mrb[0].mxu1 %vm240_vm0, %v342_v63 }
 0x28a   :  { %v426_v2 = vpop.f32.mrb[0].mxu1 }
 0x28b   :  { %v427_v3 = vadd.f32 %v426_v2, %v356_v1  ;;  %v494_v4 = vpop.f32.mrb[1].mxu1 }
 0x28d   :  { %v456_v5 = vmul.f32 -1.442695, %v427_v3 }
 0x28f   :  { %541 = vpow2.f32 %v456_v5 }
 0x299   :  { %v542_v6 = vpop.eup %541 }
 0x29a   :  { %v433_v7 = vadd.f32 1.0, %v542_v6 }
 0x29c   :  { %543 = vrcp.f32 %v433_v7 }
 0x2a6   :  { %v544_v8 = vpop.eup %543 }
 0x2a7   :  { %436 = vst [vmem:[#allocation3] sm:$0x1] %v544_v8 }
 0x2a8   :  { %556 = shalt.err (!%p553_p4)
}
 0x2a9   :  { %s557_s15 = scalar_lea.hbm %s740_s9, 16 }
 0x2aa   :  { %p558_p5 = scmp.ne.s32.totalorder %s740_s9, %s557_s15  ;;  %p561_p6 = scmp.lt.u32.totalorder %s557_s15, %s740_s9 }
 0x2ac   :  { %p563_p7 = pnand %p561_p6, %p558_p5 }
 0x2ae   :  { %566 = shalt.err (!%p563_p7)
}
 0x2af   :  { %446 = dma.vmem_to_hbm [thread:$0]  %s444_s12, 16, %s740_s9, [#allocation4]  }
 0x2b0   :  { %567 = dma.done.wait [#allocation4], 16  }
 0x2b1   :  { %568 = vsyncadd [#allocation4], 4294967280 }
 0x2b2   :  { %450 = vsyncpa [#allocation4], 1 }

</bundles_post_ra>
